<compile_context>
chip_gen: v7x
topology: tpu7x:2x2x1
jax: 0.10.0
libtpu: 0.0.40
codegen_flags: <defaults>
</compile_context>

<pallas_src>
import functools

import jax
import jax.numpy as jnp
from jax import lax
from jax.experimental import pallas as pl
from jax.experimental.pallas import tpu as pltpu


def _mlp_kernel(x_ref,
                w1_ref, b1_ref,
                w2_ref, b2_ref,
                w34_ref, b34_ref,
                o_ref):
    # x tile in natural [TILE_B, in_dim] layout; cast matmul operand in-kernel.
    x = x_ref[...].astype(w1_ref.dtype)                       # [TILE_B, in_dim]

    # linear1 + relu: contract x's last dim directly -> [64, TILE_B]
    h1 = lax.dot_general(w1_ref[...], x, (((1,), (1,)), ((), ())),
                         preferred_element_type=jnp.float32) + b1_ref[...]
    h1 = jnp.maximum(h1, 0.0)

    # linear2 + sigmoid   (relu(sigmoid(z)) == sigmoid(z): redundant ReLU dropped)
    z2 = jnp.dot(w2_ref[...], h1.astype(w2_ref.dtype),
                 preferred_element_type=jnp.float32) + b2_ref[...]
    # sigmoid(z) = 1 / (1 + exp(-z)) : exp + approx reciprocal both on the EUP.
    h2 = pl.reciprocal(1.0 + jnp.exp(-z2), approx=True)       # [32, TILE_B]

    # fused linear3 @ linear4  (W34 = W4 @ W3, b34 = W4 @ b3 + b4)
    out = jnp.dot(w34_ref[...], h2.astype(w34_ref.dtype),
                  preferred_element_type=jnp.float32) + b34_ref[...]
    o_ref[...] = out.astype(o_ref.dtype)                      # [out_dim, TILE_B]


def _round_up(n, m):
    return ((n + m - 1) // m) * m


def _mymodel_forward_impl(x, params, *, tile_b=8192, use_bf16=True):
    """x: [B, input_dim] float32; params hold PyTorch-layout weights [out, in]
    and biases [out, 1].  Returns [B, out_dim] float32."""
    B, input_dim = x.shape
    out_dim = params["w4"].shape[0]

    # Fold linear3 / linear4 (no nonlinearity between them -> exact).
    w34 = params["w4"] @ params["w3"]                   # [out_dim, 32]
    b34 = params["w4"] @ params["b3"] + params["b4"]    # [out_dim, 1]

    mm_dtype = jnp.bfloat16 if use_bf16 else jnp.float32
    w1 = params["w1"].astype(mm_dtype)
    w2 = params["w2"].astype(mm_dtype)
    w34 = w34.astype(mm_dtype)
    b1 = params["b1"].astype(jnp.float32)
    b2 = params["b2"].astype(jnp.float32)
    b34 = b34.astype(jnp.float32)

    # Tile: as large as possible (amortize ~0.35us/grid-step overhead) but at
    # least 2 grid steps so both v7x TensorCores get work; multiple of 128.
    # Larger tiles can be swept on v6e/v7x together with vmem_limit_bytes.
    tile = max(128, min(tile_b, _round_up(pl.cdiv(B, 2), 128)))
    n_tiles = pl.cdiv(B, tile)                          # ragged last tile is masked

    # Weights/biases: full block, constant index_map -> VMEM-resident, DMA'd once.
    const2d = lambda a: pl.BlockSpec(a.shape, lambda i: (0, 0))

    out_t = pl.pallas_call(
        _mlp_kernel,
        out_shape=jax.ShapeDtypeStruct((out_dim, B), jnp.float32),
        grid=(n_tiles,),
        in_specs=[
            pl.BlockSpec((tile, input_dim), lambda i: (i, 0)),   # x tile, natural layout
            const2d(w1), const2d(b1),
            const2d(w2), const2d(b2),
            const2d(w34), const2d(b34),
        ],
        out_specs=pl.BlockSpec((out_dim, tile), lambda i: (0, i)),  # lane-dense store
        compiler_params=pltpu.CompilerParams(
            dimension_semantics=("parallel",),
            vmem_limit_bytes=32 * 1024 * 1024),
    )(x, w1, b1, w2, b2, w34, b34)

    # Tiny [out_dim, B] -> [B, out_dim] transpose, fused under jit.
    return out_t.T


# jit the whole wrapper so the fold / casts / final transpose compile once.
mymodel_forward = jax.jit(_mymodel_forward_impl,
                          static_argnames=("tile_b", "use_bf16"))


def init_params(key, input_dim, output_dim):
    """PyTorch-layout params: W[out, in], b[out, 1], uniform +-1/sqrt(fan_in)."""
    dims = [(input_dim, 64), (64, 32), (32, 16), (16, output_dim)]
    params = {}
    for idx, (fan_in, fan_out) in enumerate(dims, start=1):
        key, kw, kb = jax.random.split(key, 3)
        bound = 1.0 / jnp.sqrt(float(fan_in))
        params[f"w{idx}"] = jax.random.uniform(
            kw, (fan_out, fan_in), jnp.float32, minval=-bound, maxval=bound)
        params[f"b{idx}"] = jax.random.uniform(
            kb, (fan_out, 1), jnp.float32, minval=-bound, maxval=bound)
    return params


def _reference_forward(x, p):
    """Pure-JAX reference matching the PyTorch module exactly (unfused)."""
    h = jnp.maximum(x @ p["w1"].T + p["b1"].T, 0.0)
    h = jnp.maximum(jax.nn.sigmoid(h @ p["w2"].T + p["b2"].T), 0.0)
    h = h @ p["w3"].T + p["b3"].T
    return h @ p["w4"].T + p["b4"].T


if __name__ == "__main__":
    key = jax.random.PRNGKey(0)
    kx, kp = jax.random.split(key)

    # kaggle bike: ~12 features, 1 target.  Batch deliberately not a multiple
    # of 128 to exercise the masked ragged-tile path.
    batch, input_dim, output_dim = 200, 12, 1
    x = jax.random.normal(kx, (batch, input_dim), jnp.float32)
    params = init_params(kp, input_dim, output_dim)

    ref = _reference_forward(x, params)

    # Default path: bf16 matmul operands, f32 accumulation/biases.
    out = mymodel_forward(x, params)
    out = jax.block_until_ready(out)
    assert out.shape == (batch, output_dim)
    assert jnp.allclose(out, ref, atol=5e-2, rtol=5e-2), "bf16 mismatch vs reference"

    # f32 operand path (tighter tolerance; approx reciprocal in sigmoid).
    out_f32 = mymodel_forward(x, params, use_bf16=False)
    out_f32 = jax.block_until_ready(out_f32)
    assert jnp.allclose(out_f32, ref, atol=2e-3, rtol=2e-3), "f32 mismatch vs reference"

    print("KERNEL_OK")
</pallas_src>

<mosaic_0001>
module attributes {stable_mosaic.version = 11 : i64} {
  func.func @_mlp_kernel(%arg0: i32, %arg1: memref<128x12xf32, #tpu.memory_space<vmem>>, %arg2: memref<64x12xbf16, #tpu.memory_space<vmem>>, %arg3: memref<64x1xf32, #tpu.memory_space<vmem>>, %arg4: memref<32x64xbf16, #tpu.memory_space<vmem>>, %arg5: memref<32x1xf32, #tpu.memory_space<vmem>>, %arg6: memref<1x32xbf16, #tpu.memory_space<vmem>>, %arg7: memref<1x1xf32, #tpu.memory_space<vmem>>, %arg8: memref<1x128xf32, #tpu.memory_space<vmem>>) attributes {dimension_semantics = [#tpu.dimension_semantics<parallel>], iteration_bounds = array<i64: 2>, scalar_prefetch = 0 : i64, scratch_operands = 0 : i64, tpu.core_type = #tpu.core_type<tc>, window_params = [{transform_indices = @transform_0, window_bounds = array<i64: 128, 12>}, {pipeline_mode = #tpu.pipeline_mode<synchronous>, transform_indices = @transform_1, window_bounds = array<i64: 64, 12>}, {pipeline_mode = #tpu.pipeline_mode<synchronous>, transform_indices = @transform_2, window_bounds = array<i64: 64, 1>}, {pipeline_mode = #tpu.pipeline_mode<synchronous>, transform_indices = @transform_3, window_bounds = array<i64: 32, 64>}, {pipeline_mode = #tpu.pipeline_mode<synchronous>, transform_indices = @transform_4, window_bounds = array<i64: 32, 1>}, {pipeline_mode = #tpu.pipeline_mode<synchronous>, transform_indices = @transform_5, window_bounds = array<i64: 1, 32>}, {pipeline_mode = #tpu.pipeline_mode<synchronous>, transform_indices = @transform_6, window_bounds = array<i64: 1, 1>}, {transform_indices = @transform_7, window_bounds = array<i64: 1, 128>}]} {
    %c0 = arith.constant 0 : index
    %c0_0 = arith.constant 0 : index
    %0 = vector.load %arg1[%c0, %c0_0] : memref<128x12xf32, #tpu.memory_space<vmem>>, vector<128x12xf32>
    %1 = arith.truncf %0 : vector<128x12xf32> to vector<128x12xbf16>
    %c0_1 = arith.constant 0 : index
    %c0_2 = arith.constant 0 : index
    %2 = vector.load %arg2[%c0_1, %c0_2] : memref<64x12xbf16, #tpu.memory_space<vmem>>, vector<64x12xbf16>
    %cst = arith.constant dense<0.000000e+00> : vector<64x128xf32>
    %3 = tpu.matmul %2, %1, %cst {dimension_numbers = #tpu.dot_dimension_numbers<[1], [1], [0], [0], [0, 0, 1, 0], [], []>} : vector<64x12xbf16>, vector<128x12xbf16>, vector<64x128xf32> -> vector<64x128xf32>
    %c0_3 = arith.constant 0 : index
    %c0_4 = arith.constant 0 : index
    %4 = vector.load %arg3[%c0_3, %c0_4] : memref<64x1xf32, #tpu.memory_space<vmem>>, vector<64x1xf32>
    %5 = vector.broadcast %4 : vector<64x1xf32> to vector<64x128xf32>
    %6 = arith.addf %3, %5 : vector<64x128xf32>
    %cst_5 = arith.constant 0.000000e+00 : f32
    %7 = vector.broadcast %cst_5 : f32 to vector<64x128xf32>
    %8 = arith.maximumf %6, %7 : vector<64x128xf32>
    %c0_6 = arith.constant 0 : index
    %c0_7 = arith.constant 0 : index
    %9 = vector.load %arg4[%c0_6, %c0_7] : memref<32x64xbf16, #tpu.memory_space<vmem>>, vector<32x64xbf16>
    %10 = arith.truncf %8 : vector<64x128xf32> to vector<64x128xbf16>
    %cst_8 = arith.constant dense<0.000000e+00> : vector<32x128xf32>
    %11 = tpu.matmul %9, %10, %cst_8 {dimension_numbers = #tpu.dot_dimension_numbers<[1], [0], [0], [1], [0, 0, 1, 1], [], []>} : vector<32x64xbf16>, vector<64x128xbf16>, vector<32x128xf32> -> vector<32x128xf32>
    %c0_9 = arith.constant 0 : index
    %c0_10 = arith.constant 0 : index
    %12 = vector.load %arg5[%c0_9, %c0_10] : memref<32x1xf32, #tpu.memory_space<vmem>>, vector<32x1xf32>
    %13 = vector.broadcast %12 : vector<32x1xf32> to vector<32x128xf32>
    %14 = arith.addf %11, %13 : vector<32x128xf32>
    %cst_11 = arith.constant 0.000000e+00 : f32
    %15 = vector.broadcast %cst_11 : f32 to vector<32x128xf32>
    %16 = arith.subf %15, %14 : vector<32x128xf32>
    %17 = math.exp %16 : vector<32x128xf32>
    %cst_12 = arith.constant 1.000000e+00 : f32
    %18 = vector.broadcast %cst_12 : f32 to vector<32x128xf32>
    %19 = arith.addf %18, %17 : vector<32x128xf32>
    %20 = tpu.reciprocal %19 {approx = true} : vector<32x128xf32> -> vector<32x128xf32>
    %c0_13 = arith.constant 0 : index
    %c0_14 = arith.constant 0 : index
    %21 = vector.load %arg6[%c0_13, %c0_14] : memref<1x32xbf16, #tpu.memory_space<vmem>>, vector<1x32xbf16>
    %22 = arith.truncf %20 : vector<32x128xf32> to vector<32x128xbf16>
    %cst_15 = arith.constant dense<0.000000e+00> : vector<1x128xf32>
    %23 = tpu.matmul %21, %22, %cst_15 {dimension_numbers = #tpu.dot_dimension_numbers<[1], [0], [0], [1], [0, 0, 1, 1], [], []>} : vector<1x32xbf16>, vector<32x128xbf16>, vector<1x128xf32> -> vector<1x128xf32>
    %c0_16 = arith.constant 0 : index
    %c0_17 = arith.constant 0 : index
    %24 = vector.load %arg7[%c0_16, %c0_17] : memref<1x1xf32, #tpu.memory_space<vmem>>, vector<1x1xf32>
    %25 = vector.broadcast %24 : vector<1x1xf32> to vector<1x128xf32>
    %26 = arith.addf %23, %25 : vector<1x128xf32>
    %c0_18 = arith.constant 0 : index
    %c0_19 = arith.constant 0 : index
    %27 = vector.load %arg8[%c0_18, %c0_19] : memref<1x128xf32, #tpu.memory_space<vmem>>, vector<1x128xf32>
    tpu.vector_store %arg8[%c0_18, %c0_19], %26 {strides = array<i32>} : memref<1x128xf32, #tpu.memory_space<vmem>>, vector<1x128xf32>,
    return
  }
  func.func @transform_0(%arg0: i32) -> (i32, i32) {
    %c0_i32 = arith.constant 0 : i32
    %c0_i32_0 = arith.constant 0 : i32
    return %arg0, %c0_i32 : i32, i32
  }
  func.func @transform_1(%arg0: i32) -> (i32, i32) {
    %c0_i32 = arith.constant 0 : i32
    %c0_i32_0 = arith.constant 0 : i32
    %c0_i32_1 = arith.constant 0 : i32
    return %c0_i32, %c0_i32_0 : i32, i32
  }
  func.func @transform_2(%arg0: i32) -> (i32, i32) {
    %c0_i32 = arith.constant 0 : i32
    %c0_i32_0 = arith.constant 0 : i32
    %c0_i32_1 = arith.constant 0 : i32
    return %c0_i32, %c0_i32_0 : i32, i32
  }
  func.func @transform_3(%arg0: i32) -> (i32, i32) {
    %c0_i32 = arith.constant 0 : i32
    %c0_i32_0 = arith.constant 0 : i32
    %c0_i32_1 = arith.constant 0 : i32
    return %c0_i32, %c0_i32_0 : i32, i32
  }
  func.func @transform_4(%arg0: i32) -> (i32, i32) {
    %c0_i32 = arith.constant 0 : i32
    %c0_i32_0 = arith.constant 0 : i32
    %c0_i32_1 = arith.constant 0 : i32
    return %c0_i32, %c0_i32_0 : i32, i32
  }
  func.func @transform_5(%arg0: i32) -> (i32, i32) {
    %c0_i32 = arith.constant 0 : i32
    %c0_i32_0 = arith.constant 0 : i32
    %c0_i32_1 = arith.constant 0 : i32
    return %c0_i32, %c0_i32_0 : i32, i32
  }
  func.func @transform_6(%arg0: i32) -> (i32, i32) {
    %c0_i32 = arith.constant 0 : i32
    %c0_i32_0 = arith.constant 0 : i32
    %c0_i32_1 = arith.constant 0 : i32
    return %c0_i32, %c0_i32_0 : i32, i32
  }
  func.func @transform_7(%arg0: i32) -> (i32, i32) {
    %c0_i32 = arith.constant 0 : i32
    %c0_i32_0 = arith.constant 0 : i32
    return %c0_i32, %arg0 : i32, i32
  }
}

</mosaic_0001>

<bundles_post_ra>
// kernel: _mymodel_forward_impl.1
= control target key start
LH: loop header
LB: loop body
LE: loop exit
PB: predicated region body
PF: predicated region fallthrough
CT: control target
= control target key end

     0   :  { %s1223_s0 = inlined_call_operand.vmem [shape: f32[200,12], index: 0, kind: input, shape index: {}]   ;;  %s1224_s1 = inlined_call_operand.vmem [shape: bf16[64,12], index: 1, kind: input, shape index: {}]   ;;  %s1225_s2 = inlined_call_operand.vmem [shape: f32[64,1], index: 2, kind: input, shape index: {}]   ;;  %s1226_s3 = inlined_call_operand.vmem [shape: bf16[32,64], index: 3, kind: input, shape index: {}]   ;;  %s1227_s4 = inlined_call_operand.vmem [shape: f32[32,1], index: 4, kind: input, shape index: {}]   ;;  %s1228_s5 = inlined_call_operand.vmem [shape: bf16[1,32], index: 5, kind: input, shape index: {}]   ;;  %s1229_s6 = inlined_call_operand.<no memory space> [shape: f32[1,1], index: 6, kind: input, shape index: {}]   ;;  %s1230_s7 = inlined_call_operand.hbm [shape: f32[1,200], index: 7, kind: output, shape index: {}]  }
   0x1   :  { %v12_v0 = vstv %s1229_s6 }
   0x2   :  { %13 = vst [vmem:[#allocation2] sm:$0x1] %v12_v0 }
   0x3   :  { %14 = vsyncpa [#allocation4], 0 }
   0x4   :  { %16 = vsyncpa [#allocation4 + $0x1], 0  ;;  %s1027_s26 = smov 0   ;;  %s1029_s27 = smov 0  }
   0x5   :  { %s1031_s28 = smov 0   ;;  %s1033_s29 = smov 0  }
   0x6 LB: > { %s754_s6 = sadd.s32 4294967295, %s978_s29   ;;  %s755_s30 = sadd.s32 4294967294, %s978_s29   ;;  %s978_s29 = sphi %s1033_s29, %s1236_s29   ;;  %s974_s28 = sphi %s1031_s28, %s1235_s28   ;;  %s970_s27 = sphi %s1029_s27, %s1234_s27   ;;  %s966_s26 = sphi %s1027_s26, %s1233_s26  }
   0x7   : > { %s1050_s8 = sadd.s32 1, %s978_s29   ;;  %s181_s9 = sadd.s32 1, %s974_s28 }
   0x8   : > { %s178_s10 = ssub.s32 %s978_s29, %s1050_s8  ;;  %p191_p0 = scmp.ne.s32.totalorder %s974_s28, %s970_s27 }
   0x9   : > { %p179_p1 = scmp.eq.s32.totalorder %s178_s10, 0  ;;  %p192_p2 = scmp.eq.s32.totalorder %s754_s6, 1 }
   0xa   : > { %p197_p3 = scmp.ne.s32.totalorder %s970_s27, %s966_s26  ;;  %p198_p4 = scmp.eq.s32.totalorder %s755_s30, 1 }
   0xb   : > { %s1060_s11 = scalar_select %p179_p1, %s974_s28, %s181_s9  }
   0xc   : > { %p1062_p5 = por %p192_p2, %p191_p0  ;;  %p1066_p6 = por %p198_p4, %p197_p3 }
   0xd   : > { %p758_p7 = scmp.ge.s32.totalorder %s978_s29, 1  ;;  %p251_p8 = scmp.lt.s32.totalorder %s978_s29, 3 }
   0xf   : > { %p252_p9 = pnand %p758_p7, %p251_p8 }
  0x10   : > { %s1072_s14 = sshll.u32 (!%p252_p9), %s754_s6, 4  ;;  %v894_v1 = vld [vmem:[%s1224_s1] sm:$0xff] (!%p252_p9)   ;;  %vm401_vm0 = vcmask (!%p252_p9), 97280   ;;  %v980_v2 = vmov (!%p252_p9), 0   ;;  %v335_v4 = vld [vmem:[%s1225_s2 + $0x10] sm:$0xff] (!%p252_p9)  ;;  %v334_v5 = vld [vmem:[%s1225_s2 + $0x8] sm:$0xff] (!%p252_p9) }
  0x11   : > { %255 = sbr.rel (%p252_p9) target bundleno = 814 (0x32e), region = 48  ;;  %p291_p10 = scmp.lt.s32.totalorder (!%p252_p9), %s1072_s14, 24  ;;  %814 = vmatprep.mubr.msk.bf16.mxu0 (!%p252_p9), %vm401_vm0, %v894_v1  ;;  %892 = vset.pattern.permute.xlu0 (!%p252_p9), %v980_v2  ;;  %v333_v3 = vld [vmem:[%s1225_s2] sm:$0xff] (!%p252_p9)  ;;  %v336_v6 = vld [vmem:[%s1225_s2 + $0x18] sm:$0xff] (!%p252_p9)  ;;  %v338_v15 = vld [vmem:[%s1225_s2 + $0x28] sm:$0xff] (!%p252_p9)  ;;  %vm553_vm1 = vcmask (!%p252_p9), 523264  }
  0x12   : > { %893 = vset.pattern.permute.xlu1 (!%p252_p9), %v980_v2  ;;  %343 = vperm.xlu0 (!%p252_p9), %892, %v333_v3   ;;  %v337_v14 = vld [vmem:[%s1225_s2 + $0x20] sm:$0xff] (!%p252_p9)  ;;  %v339_v18 = vld [vmem:[%s1225_s2 + $0x30] sm:$0xff] (!%p252_p9)  ;;  %v340_v19 = vld [vmem:[%s1225_s2 + $0x38] sm:$0xff] (!%p252_p9)  ;;  %vm982_vm2 = vmmov (!%p252_p9), 0   ;;  %vm642_vm3 = vcmask (!%p252_p9), 261120   ;;  %s284_s10 = sand.u32 (!%p252_p9), 1, %s970_s27   ;;  %s1181_s19 = scalar_lea.hbm (!%p252_p9), %s1230_s7, %s1072_s14 }
  0x13   : > { %353 = vperm.xlu1 (!%p252_p9), %893, %v335_v4   ;;  %v519_v22 = vld [vmem:[%s1227_s4] sm:$0xff] (!%p252_p9)  ;;  %v520_v23 = vld [vmem:[%s1227_s4 + $0x8] sm:$0xff] (!%p252_p9)  ;;  %v521_v26 = vld [vmem:[%s1227_s4 + $0x10] sm:$0xff] (!%p252_p9)  ;;  %s285_s15 = scalar_lea.vmem (!%p252_p9), [#allocation3], %s284_s10  ;;  %s983_s21 = smov (!%p252_p9), [#allocation3]  }
  0x14   : > { %v522_v27 = vld [vmem:[%s1227_s4 + $0x18] sm:$0xff] (!%p252_p9)  ;;  %v632_v30 = vld [vmem:[#allocation2] sm:$0x1] (!%p252_p9)  ;;  %v895_v48 = vld [vmem:[%s1224_s1 + $0x8] sm:$0xff] (!%p252_p9)   ;;  %s700_s16 = sshll.u32 (!%p252_p9), %s285_s15, 4  ;;  %s920_s22 = sshll.u32 (!%p252_p9), %s983_s21, 4  ;;  %s1183_s16 = int_to_ptr.vmem [resolvable:$true] %s700_s16  ;;  %s921_s22 = int_to_ptr.vmem [resolvable:$false] %s920_s22 }
  0x15   : > { %v896_v49 = vld [vmem:[%s1224_s1 + $0x10] sm:$0xff] (!%p252_p9)   ;;  %v897_v50 = vld [vmem:[%s1224_s1 + $0x18] sm:$0xff] (!%p252_p9)   ;;  %v898_v51 = vld [vmem:[%s1226_s3] sm:$0xff] (!%p252_p9)   ;;  %s922_s23 = scalar_lea.vmem (!%p252_p9), %s921_s22, 32  ;;  %p923_p0 = scmp.lt.s32.totalorder (!%p252_p9), %s1183_s16, %s921_s22 }
  0x16   : > { %348 = vperm.xlu0 (!%p252_p9), %892, %v334_v5   ;;  %830 = vmatprep.mubr.msk.bf16.mxu1 (!%p252_p9), %vm553_vm1, %v898_v51 }
  0x17   : > { %358 = vperm.xlu1 (!%p252_p9), %893, %v336_v6  }
  0x18   : > { %s292_s17 = scalar_select %p291_p10, %s1072_s14, 24 }
  0x1a   : > { %s760_s20 = sshll.u32 %s292_s17, 3  ;;  %363 = vperm.xlu0 %892, %v337_v14  }
  0x1b   : > { %s1089_s25 = scalar_lea.vmem %s1223_s0, %s760_s20  ;;  %368 = vperm.xlu1 %893, %v338_v15   ;;  %s688_s20 = scalar_lea.sflag [#allocation4], %s284_s10 }
  0x1c   : > { %v301_v7 = vld [vmem:[%s1089_s25] sm:$0xff]  ;;  %v302_v8 = vld [vmem:[%s1089_s25 + $0x8] sm:$0xff]  ;;  %v303_v9 = vld [vmem:[%s1089_s25 + $0x10] sm:$0xff] }
  0x1d   : > { %v317_v10 = vpack.c.bf16 %v302_v8, %v301_v7  ;;  %v304_v11 = vld [vmem:[%s1089_s25 + $0x18] sm:$0xff]  ;;  %v305_v16 = vld [vmem:[%s1089_s25 + $0x20] sm:$0xff]  ;;  %v306_v17 = vld [vmem:[%s1089_s25 + $0x28] sm:$0xff] }
  0x1e   : > { %v318_v12 = vpack.c.bf16 %v304_v11, %v303_v9  ;;  %v319_v21 = vpack.c.bf16 %v306_v17, %v305_v16  ;;  %373 = vperm.xlu0 %892, %v339_v18   ;;  %v307_v24 = vld [vmem:[%s1089_s25 + $0x30] sm:$0xff]  ;;  %v308_v25 = vld [vmem:[%s1089_s25 + $0x38] sm:$0xff]  ;;  %v309_v31 = vld [vmem:[%s1089_s25 + $0x40] sm:$0xff] }
  0x1f   : > { %842 = vmatprep.subr.msk.bf16.mxu0 %vm401_vm0, %v317_v10  ;;  %v415_v13 = vsel %vm401_vm0, %v317_v10, 0  ;;  %378 = vperm.xlu1 %893, %v340_v19   ;;  %v320_v29 = vpack.c.bf16 %v308_v25, %v307_v24  ;;  %v310_v32 = vld [vmem:[%s1089_s25 + $0x48] sm:$0xff]  ;;  %v311_v35 = vld [vmem:[%s1089_s25 + $0x50] sm:$0xff]  ;;  %v312_v36 = vld [vmem:[%s1089_s25 + $0x58] sm:$0xff]  ;;  %v981_v25 = vmov 0.0  }
  0x20   : > { %799 = vmatpush3.bf16.xpose.msra.mxu0 %v415_v13  ;;  %v418_v20 = vsel %vm401_vm0, %v318_v12, 0  ;;  %v421_v28 = vsel %vm401_vm0, %v319_v21, 0  ;;  %v321_v34 = vpack.c.bf16 %v310_v32, %v309_v31  ;;  %v322_v38 = vpack.c.bf16 %v312_v36, %v311_v35  ;;  %v313_v39 = vld [vmem:[%s1089_s25 + $0x60] sm:$0xff]  ;;  %v314_v40 = vld [vmem:[%s1089_s25 + $0x68] sm:$0xff]  ;;  %v315_v43 = vld [vmem:[%s1089_s25 + $0x70] sm:$0xff] }
  0x21   : > { %843 = vmatprep.subr.msk.bf16.mxu0 %vm401_vm0, %v318_v12  ;;  %v424_v33 = vsel %vm401_vm0, %v320_v29, 0  ;;  %v323_v42 = vpack.c.bf16 %v314_v40, %v313_v39  ;;  %v316_v44 = vld [vmem:[%s1089_s25 + $0x78] sm:$0xff]  ;;  %v899_v24 = vld [vmem:[%s1226_s3 + $0x8] sm:$0xff]   ;;  %s916_s25 = scalar_lea.vmem %s1183_s16, 16 }
  0x22   : > { %525 = vperm.xlu0 %892, %v519_v22   ;;  %v427_v37 = vsel %vm401_vm0, %v321_v34, 0  ;;  %v430_v41 = vsel %vm401_vm0, %v322_v38, 0  ;;  %v324_v46 = vpack.c.bf16 %v316_v44, %v315_v43  ;;  %p917_p11 = scmp.ne.s32.totalorder %s1183_s16, %s916_s25  ;;  %p924_p1 = scmp.lt.s32.totalorder %s922_s23, %s916_s25 }
  0x23   : > { %530 = vperm.xlu1 %893, %v520_v23   ;;  %v433_v45 = vsel %vm401_vm0, %v323_v42, 0 }
  0x24   : > { %v436_v47 = vsel %vm401_vm0, %v324_v46, 0  ;;  %p918_p12 = pnand %p917_p11, %p1062_p5  ;;  %p925_p2 = por %p924_p1, %p923_p0 }
  0x26   : > { %535 = vperm.xlu0 %892, %v521_v26   ;;  %p919_p13 = pneg %p918_p12 }
  0x27   : > { %540 = vperm.xlu1 %893, %v522_v27  }
  0x28   : > { %801 = vmatpush3.bf16.xpose.msra.mxu0 %v418_v20  ;;  %p926_p3 = pnand %p925_p2, %p919_p13 }
  0x29   : > { %844 = vmatprep.subr.msk.bf16.mxu0 %vm401_vm0, %v319_v21 }
  0x2a   : > { %635 = vperm.xlu0 %892, %v632_v30  }
  0x30   : > { %803 = vmatpush3.bf16.xpose.msra.mxu0 %v421_v28 }
  0x31   : > { %845 = vmatprep.subr.msk.bf16.mxu0 %vm401_vm0, %v320_v29 }
  0x38   : > { %805 = vmatpush3.bf16.xpose.msra.mxu0 %v424_v33 }
  0x39   : > { %846 = vmatprep.subr.msk.bf16.mxu0 %vm401_vm0, %v321_v34 }
  0x40   : > { %807 = vmatpush3.bf16.xpose.msra.mxu0 %v427_v37 }
  0x41   : > { %847 = vmatprep.subr.msk.bf16.mxu0 %vm401_vm0, %v322_v38 }
  0x48   : > { %809 = vmatpush3.bf16.xpose.msra.mxu0 %v430_v41 }
  0x49   : > { %848 = vmatprep.subr.msk.bf16.mxu0 %vm401_vm0, %v323_v42 }
  0x50   : > { %811 = vmatpush3.bf16.xpose.msra.mxu0 %v433_v45 }
  0x51   : > { %849 = vmatprep.subr.msk.bf16.mxu0 %vm401_vm0, %v324_v46 }
  0x58   : > { %813 = vmatpush3.bf16.xpose.msra.mxu0 %v436_v47 }
  0x5f   : > { %815 = vmatmul.mubr.msk.bf16.vlgmr.msra.gmra.mrb[0].mxu0 %vm401_vm0, %v895_v48 }
  0x60   : > { %818 = vmatprep.mubr.msk.bf16.mxu0 %vm401_vm0, %v896_v49 }
  0x67   : > { %819 = vmatmul.mubr.msk.bf16.gmra.mrb[4].mxu0 %vm401_vm0, %v897_v50 }
  0x91   : > { %v344_v52 = vpop.permute.xlu0 %343 }
  0x92   : > { %v354_v53 = vpop.permute.xlu1 %353 }
  0x95   : > { %v349_v54 = vpop.permute.xlu0 %348 }
  0x96   : > { %v359_v55 = vpop.permute.xlu1 %358 }
  0x99   : > { %v364_v59 = vpop.permute.xlu0 %363 }
  0x9a   : > { %v369_v0 = vpop.permute.xlu1 %368 }
  0x9d   : > { %v374_v7 = vpop.permute.xlu0 %373 }
  0x9e   : > { %v379_v12 = vpop.permute.xlu1 %378 }
  0xa1   : > { %v526_v26 = vpop.permute.xlu0 %525 }
  0xa2   : > { %v531_v27 = vpop.permute.xlu1 %530 }
  0xa5   : > { %v536_v28 = vpop.permute.xlu0 %535 }
  0xa6   : > { %v541_v32 = vpop.permute.xlu1 %540 }
 0x132   : > { %v816_v56 = vpop.f32.mrb[0].mxu0 }
 0x133   : > { %v481_v57 = vadd.f32 %v816_v56, %v354_v53  ;;  %v472_v58 = vpop.f32.mrb[1].mxu0 }
 0x134   : > { %v473_v60 = vadd.f32 %v472_v58, %v344_v52  ;;  %v817_v61 = vpop.f32.mrb[2].mxu0 }
 0x135   : > { %v484_v62 = vadd.f32 %v817_v61, %v359_v55  ;;  %v475_v63 = vpop.f32.mrb[3].mxu0  ;;  %v505_v2 = vmax.f32 %v481_v57, 0.0  ;;  %v638_v61 = vlaneseq }
 0x136   : > { %v476_v1 = vadd.f32 %v475_v63, %v349_v54  ;;  %v503_v4 = vmax.f32 %v473_v60, 0.0  ;;  %v629_v60 = vld [vmem:[%s1228_s5] sm:$0x1] }
 0x137   : > { %v506_v3 = vmax.f32 %v484_v62, 0.0  ;;  %v639_v62 = vshrl.u32 %v638_v61, 7 }
 0x138   : > { %v504_v5 = vmax.f32 %v476_v1, 0.0 }
 0x139   : > { %v516_v6 = vpack.c.bf16 %v506_v3, %v505_v2  ;;  %v640_v63 = vsub.s32 0, %v639_v62 }
 0x13a   : > { %v820_v8 = vpop.f32.mrb[4].mxu0  ;;  %v515_v9 = vpack.c.bf16 %v504_v5, %v503_v4 }
 0x13b   : > { %v497_v10 = vadd.f32 %v820_v8, %v374_v7  ;;  %v488_v11 = vpop.f32.mrb[5].mxu0 }
 0x13c   : > { %v489_v13 = vadd.f32 %v488_v11, %v364_v59  ;;  %v821_v14 = vpop.f32.mrb[6].mxu0  ;;  %822 = vmatprep.subr.bf16.mxu1 %v515_v9 }
 0x13d   : > { %v500_v15 = vadd.f32 %v821_v14, %v379_v12  ;;  %v491_v16 = vpop.f32.mrb[7].mxu0  ;;  %823 = vmatpush3.bf16.msra.mxu1 %v515_v9  ;;  %v509_v18 = vmax.f32 %v497_v10, 0.0 }
 0x13e   : > { %v492_v17 = vadd.f32 %v491_v16, %v369_v0  ;;  %824 = vmatprep.subr.bf16.mxu1 %v516_v6  ;;  %v507_v20 = vmax.f32 %v489_v13, 0.0  ;;  %v636_v0 = vpop.permute.xlu0 %635 }
 0x13f   : > { %v510_v19 = vmax.f32 %v500_v15, 0.0  ;;  %v641_v1 = vrot.slane %v636_v0, %v640_v63 }
 0x140   : > { %v508_v21 = vmax.f32 %v492_v17, 0.0 }
 0x141   : > { %v518_v22 = vpack.c.bf16 %v510_v19, %v509_v18  ;;  %825 = vmatpush3.bf16.msra.mxu1 %v516_v6 }
 0x142   : > { %v517_v23 = vpack.c.bf16 %v508_v21, %v507_v20 }
 0x144   : > { %826 = vmatprep.subr.bf16.mxu1 %v517_v23 }
 0x145   : > { %827 = vmatpush3.bf16.msra.mxu1 %v517_v23 }
 0x146   : > { %828 = vmatprep.subr.bf16.mxu1 %v518_v22 }
 0x149   : > { %829 = vmatpush3.bf16.msra.mxu1 %v518_v22 }
 0x14a   : > { %834 = vmatprep.subr.bf16.mxu1 %v981_v25 }
 0x14c   : > { %831 = vmatmul.mubr.msk.bf16.vlgmr.msra.gmra.mrb[0].mxu1 %vm553_vm1, %v899_v24 }
 0x14d   : > { %838 = vmatprep.mubr.msk.bf16.mxu1 %vm982_vm2, %v981_v25 }
 0x21f   : > { %v832_v29 = vpop.f32.mrb[0].mxu1 }
 0x220   : > { %v603_v30 = vadd.f32 %v832_v29, %v536_v28  ;;  %v594_v31 = vpop.f32.mrb[1].mxu1 }
 0x221   : > { %v595_v33 = vadd.f32 %v594_v31, %v526_v26  ;;  %v833_v34 = vpop.f32.mrb[2].mxu1 }
 0x222   : > { %v611_v35 = vsub.f32 0.0, %v603_v30  ;;  %v606_v36 = vadd.f32 %v833_v34, %v541_v32  ;;  %v597_v37 = vpop.f32.mrb[3].mxu1 }
 0x223   : > { %v609_v38 = vsub.f32 0.0, %v595_v33  ;;  %v598_v39 = vadd.f32 %v597_v37, %v531_v27 }
 0x224   : > { %v617_v40 = vmul.f32 1.442695, %v611_v35  ;;  %v612_v41 = vsub.f32 0.0, %v606_v36 }
 0x225   : > { %v613_v42 = vmul.f32 1.442695, %v609_v38  ;;  %v610_v43 = vsub.f32 0.0, %v598_v39 }
 0x226   : > { %900 = vpow2.f32 %v617_v40  ;;  %v619_v44 = vmul.f32 1.442695, %v612_v41 }
 0x227   : > { %902 = vpow2.f32 %v613_v42  ;;  %v615_v45 = vmul.f32 1.442695, %v610_v43 }
 0x228   : > { %904 = vpow2.f32 %v619_v44 }
 0x229   : > { %906 = vpow2.f32 %v615_v45 }
 0x230   : > { %v901_v46 = vpop.eup %900 }
 0x231   : > { %v903_v47 = vpop.eup %902  ;;  %v623_v48 = vadd.f32 1.0, %v901_v46 }
 0x232   : > { %v905_v49 = vpop.eup %904  ;;  %v621_v50 = vadd.f32 1.0, %v903_v47 }
 0x233   : > { %v907_v51 = vpop.eup %906  ;;  %908 = vrcp.f32 %v623_v48  ;;  %v624_v52 = vadd.f32 1.0, %v905_v49 }
 0x234   : > { %910 = vrcp.f32 %v621_v50  ;;  %v622_v53 = vadd.f32 1.0, %v907_v51 }
 0x235   : > { %912 = vrcp.f32 %v624_v52 }
 0x236   : > { %914 = vrcp.f32 %v622_v53 }
 0x23d   : > { %v909_v54 = vpop.eup %908 }
 0x23e   : > { %v911_v55 = vpop.eup %910 }
 0x23f   : > { %v913_v56 = vpop.eup %912 }
 0x240   : > { %v915_v57 = vpop.eup %914  ;;  %v631_v58 = vpack.c.bf16 %v913_v56, %v909_v54 }
 0x241   : > { %v630_v59 = vpack.c.bf16 %v915_v57, %v911_v55 }
 0x243   : > { %835 = vmatpush3.bf16.msra.mxu1 %v630_v59 }
 0x244   : > { %836 = vmatprep.subr.bf16.mxu1 %v981_v25 }
 0x247   : > { %837 = vmatpush3.bf16.msra.mxu1 %v631_v58 }
 0x24a   : > { %839 = vmatmul.mubr.msk.bf16.vlgmr.msra.gmra.mrb[4].mxu1 %vm642_vm3, %v629_v60 }
 0x31d   : > { %v680_v2 = vpop.f32.mrb[4].mxu1 }
 0x31e   : > { %v681_v3 = vadd.f32 %v680_v2, %v641_v1  ;;  %v840_v4 = vpop.f32.mrb[5].mxu1 }
 0x31f   : > { %v683_v5 = vpop.f32.mrb[6].mxu1 }
 0x320   : > { %686 = vst [vmem:[%s285_s15] sm:$0x1] %v681_v3  ;;  %v841_v6 = vpop.f32.mrb[7].mxu1 }
 0x321   : > { %929 = shalt.err (!%p926_p3)
}
 0x322   : > { %s930_s14 = scalar_lea.hbm %s1181_s19, 16  ;;  %s934_s30 = scalar_lea.hbm %s1230_s7, 32 }
 0x323   : > { %p931_p4 = scmp.ne.s32.totalorder %s1181_s19, %s930_s14  ;;  %p935_p9 = scmp.lt.u32.totalorder %s1181_s19, %s1230_s7 }
 0x324   : > { %p936_p10 = scmp.lt.u32.totalorder %s934_s30, %s930_s14  ;;  %p938_p12 = scmp.lt.u32.totalorder %s930_s14, %s1181_s19 }
 0x325   : > { %p932_p7 = pnand %p931_p4, %p1062_p5 }
 0x326   : > { %p937_p11 = por %p936_p10, %p935_p9 }
 0x327   : > { %p933_p8 = pneg %p932_p7 }
 0x328   : > { %p939_p13 = por %p938_p12, %p937_p11 }
 0x32a   : > { %p940_p0 = pnand %p939_p13, %p933_p8 }
 0x32c   : > { %943 = shalt.err (!%p940_p0)
}
 0x32d   : > { %850 = dma.vmem_to_hbm [thread:$0]  (%p1062_p5), %s1183_s16, 16, %s1181_s19, %s688_s20  }
 0x32e PF: > { %p856_p1 = scmp.ge.s32.totalorder %s978_s29, 2  ;;  %s712_s15 = sand.u32 1, %s966_s26  }
 0x32f   : > { %s713_s17 = scalar_lea.sflag [#allocation4], %s712_s15 }
 0x330   : > { %p853_p2 = pnand %p856_p1, %p1066_p6 }
 0x332   : > { %961 = dma.done.wait (!%p853_p2), %s713_s17, 16  }
 0x333   : > { %963 = vsyncadd (!%p853_p2), %s713_s17, 4294967280  ;;  %p19_p3 = scmp.ge.s32.totalorder %s1050_s8, 4   ;;  %s1233_s26 = smov %s970_s27 }
 0x334   : > { %s1234_s27 = smov %s974_s28  ;;  %s1235_s28 = smov %s1060_s11 }
 0x335   : > { %s1236_s29 = smov %s1050_s8  ;;  %21 = sbr.rel (!%p19_p3) target bundleno = 6 (0x6), region = 83 }
 0x33c   :  { %717 = vsyncpa [#allocation4], 1 }
 0x33d   :  { %719 = vsyncpa [#allocation4 + $0x1], 1 }

</bundles_post_ra>
